<compile_context>
chip_gen: v5e
topology: v5e:2x2
jax: 0.10.0
libtpu: 0.0.40
codegen_flags: <defaults>
</compile_context>

<pallas_src>
import math

import jax
import jax.numpy as jnp
from jax.experimental import pallas as pl
from jax.experimental.pallas import tpu as pltpu


# ----------------------------------------------------------------------------
# Kernel body
# ----------------------------------------------------------------------------
def _grouped_linear_kernel(x_ref, w_ref, b_ref, o_ref):
    # x_ref: (TB, K)       native batch-major activation slab (K = tg*F)
    # w_ref: (1, K, N)     pre-packed block-diagonal / permuted weight tile
    # b_ref: (1, 1, N)     lane-dense bias slab for this group tile
    # o_ref: (TB, N)       lane-dense output slab (N = tg*O)
    y = jnp.dot(x_ref[...], w_ref[0], preferred_element_type=jnp.float32)
    y = y + b_ref[0].astype(jnp.float32)
    o_ref[...] = y.astype(o_ref.dtype)


# ----------------------------------------------------------------------------
# Tiling heuristics
# ----------------------------------------------------------------------------
def _divisors(n):
    return [d for d in range(1, n + 1) if n % d == 0]


def _choose_group_tile(G, F, O, max_dim=512):
    """How many groups are folded into one block-diagonal matmul tile.

    Layout legality for the 2-D activation / output slabs (strict (8,128) rule):
      * tg == G                       (full-extent block on the last dim), or
      * tg*F % 128 == 0 and tg*O % 128 == 0   (lane-aligned blocks).
    Among legal tiles prefer the SMALLEST one whose K=tg*F and N=tg*O stay
    within ~1-2 native MXU tiles (<= max_dim), so block-diagonal zero padding
    (extra MXU passes, weight HBM bytes, ~tg^2 weight VMEM) stays bounded.
    """
    legal = []
    for tg in _divisors(G):
        if tg == G or ((tg * F) % 128 == 0 and (tg * O) % 128 == 0):
            legal.append(tg)
    bounded = [t for t in legal if t * F <= max_dim and t * O <= max_dim]
    if bounded:
        return min(bounded)
    # TODO(synk): shapes with no lane-aligned divisor and huge G*F / G*O have no
    # cheap legal 2-D tiling; this fallback picks the smallest legal weight tile
    # but may still be large for pathological (prime, huge) G.
    return min(legal, key=lambda t: (t * F) * (t * O))


def _vmem_budget_bytes():
    """Per-generation VMEM budget for our pipelined buffers (with headroom)."""
    cap = None
    try:
        cap = int(pltpu.get_tpu_info().vmem_capacity_bytes)
    except Exception:
        cap = None
    if cap is None or cap <= 0:
        kind = ""
        try:
            kind = jax.devices()[0].device_kind.lower()
        except Exception:
            pass
        if "v2" in kind or "v3" in kind:
            cap = 16 * 1024 * 1024
        elif any(t in kind for t in ("v4", "v5", "v6", "trillium", "lite")):
            cap = 128 * 1024 * 1024          # v5e / v6e: 128 MiB per TC
        else:
            cap = 64 * 1024 * 1024           # conservative (v7x: 64 MiB per TC)
    return int(cap * 0.78)                   # ~22% headroom for compiler scratch


def _choose_batch_tiling(B, K, N, x_item, o_item, w_tile_bytes, b_tile_bytes,
                         budget, ngt):
    """Pick (tb, nbt).  Targets 512-1024 rows, VMEM-aware, sublane aligned."""
    fixed = 2 * (w_tile_bytes + b_tile_bytes)            # double-buffered W / bias
    per_row = 2 * (K * x_item + N * o_item)              # double-buffered x / out
    usable = max(budget - fixed, per_row * 8)
    max_tb = max(8, (usable // per_row) // 8 * 8)
    tb_cap = min(1024, max_tb)                           # HBM-roofline regime

    if B <= tb_cap:
        tb, nbt = B, 1                                   # full-extent block: legal
        # v7x has 2 TensorCores: if groups provide no grid parallelism, split a
        # big batch into two EXACT tiles so both cores get work (no-op on 1-TC).
        if (ngt == 1 and B >= 256 and B % 16 == 0
                and (B // 2) * per_row + fixed <= budget):
            tb, nbt = B // 2, 2
        return tb, nbt

    nbt = math.ceil(B / tb_cap)
    tb = ((math.ceil(B / nbt) + 7) // 8) * 8             # multiple of 8 (sublanes)
    return tb, nbt


# ----------------------------------------------------------------------------
# Init-time parameter packing (hoisted out of the per-call path)
# ----------------------------------------------------------------------------
def _pack_params(weight, bias, G, F, O, tg, og_order):
    ngt = G // tg
    w_gfo = jnp.transpose(weight, (0, 2, 1))             # (G, F, O)
    if og_order:
        # Output column index = o*G + g  -> kernel output is already (B, O, G)
        # in row-major order; the reshape=True epilogue becomes a free view.
        eye = jnp.eye(G, dtype=weight.dtype)
        w_p = jnp.einsum("gfo,gh->gfoh", w_gfo, eye).reshape(1, G * F, O * G)
        b_p = jnp.transpose(bias).reshape(1, 1, O * G)
    else:
        # Output column index (within a group tile) = t*O + o  (conv flat order).
        w_t = w_gfo.reshape(ngt, tg, F, O)
        eye = jnp.eye(tg, dtype=weight.dtype)
        w_p = jnp.einsum("ntfo,ts->ntfso", w_t, eye).reshape(ngt, tg * F, tg * O)
        b_p = bias.reshape(ngt, 1, tg * O)
    return w_p, b_p


def make_grouped_linear(weight, bias, *, in_nodes, num_features, out_nodes,
                        reshape=True):
    """Packs parameters once (mirrors nn.Module.__init__); returns apply(x)."""
    G, F, O = in_nodes, num_features, out_nodes
    assert weight.shape == (G, O, F)
    assert bias.shape == (G, O)

    tg = _choose_group_tile(G, F, O)
    ngt = G // tg
    og_order = reshape and ngt == 1        # write output directly in (B, O, G) order
    w_p, b_p = _pack_params(weight, bias, G, F, O, tg, og_order)
    K, N = tg * F, tg * O                  # per-step matmul dims

    w_item = jnp.dtype(w_p.dtype).itemsize
    w_tile_bytes = K * N * w_item
    b_tile_bytes = N * w_item
    budget = _vmem_budget_bytes()

    def apply(x):
        B = x.shape[0]
        assert x.shape == (B, G * F)
        x_item = jnp.dtype(x.dtype).itemsize
        o_item = x_item
        tb, nbt = _choose_batch_tiling(B, K, N, x_item, o_item,
                                       w_tile_bytes, b_tile_bytes, budget, ngt)
        Bp = tb * nbt
        xp = x if Bp == B else jnp.pad(x, ((0, Bp - B), (0, 0)))

        # Honest VMEM accounting: double-buffered tiles + 25% headroom, capped
        # at the per-generation budget (never above it).
        need = (2 * (tb * K * x_item + tb * N * o_item)
                + 2 * (w_tile_bytes + b_tile_bytes))
        vmem_limit = int(min(budget, max(need + (need >> 2), 32 * 1024 * 1024)))

        cost = pl.CostEstimate(
            flops=2 * B * G * F * O,                       # true useful flops
            transcendentals=0,
            bytes_accessed=int(x.size * x_item + w_p.size * w_item
                               + b_p.size * w_item + B * G * O * o_item))

        out = pl.pallas_call(
            _grouped_linear_kernel,
            out_shape=jax.ShapeDtypeStruct((Bp, G * O), x.dtype),
            grid_spec=pltpu.PrefetchScalarGridSpec(
                num_scalar_prefetch=0,
                # Group tiles outer, batch tiles inner: the weight block index
                # is constant across the inner axis, so it stays VMEM-resident.
                grid=(ngt, nbt),
                in_specs=[
                    pl.BlockSpec((tb, K), lambda g, b: (b, g)),        # x (native)
                    pl.BlockSpec((1, K, N), lambda g, b: (g, 0, 0)),   # packed W
                    pl.BlockSpec((1, 1, N), lambda g, b: (g, 0, 0)),   # bias slab
                ],
                out_specs=pl.BlockSpec((tb, N), lambda g, b: (b, g)),  # lane-dense
            ),
            compiler_params=pltpu.CompilerParams(
                dimension_semantics=("parallel", "parallel"),
                vmem_limit_bytes=vmem_limit,
            ),
            cost_estimate=cost,
        )(xp, w_p, b_p)                                                # (Bp, G*O)

        if Bp != B:
            out = out[:B]
        if reshape:
            if og_order:
                return out.reshape(B, O, G)        # free view: data pre-permuted
            # TODO(synk): multi-group-tile + reshape=True keeps an XLA transpose
            # epilogue (one extra HBM round trip of the output).
            return out.reshape(B, G, O).transpose(0, 2, 1)
        return out

    return apply


def grouped_linear(x, weight, bias, *, in_nodes, num_features, out_nodes,
                   reshape=True):
    """One-shot convenience wrapper (packs params then applies)."""
    return make_grouped_linear(
        weight, bias, in_nodes=in_nodes, num_features=num_features,
        out_nodes=out_nodes, reshape=reshape)(x)


# ----------------------------------------------------------------------------
# Pure-JAX reference
# ----------------------------------------------------------------------------
def _reference(x, weight, bias, *, in_nodes, num_features, out_nodes, reshape=True):
    B = x.shape[0]
    xg = x.reshape(B, in_nodes, num_features)
    y = jnp.einsum("bgf,gof->bgo", xg, weight) + bias[None, :, :]      # (B, G, O)
    if reshape:
        return y.transpose(0, 2, 1)
    return y.reshape(B, in_nodes * out_nodes)


if __name__ == "__main__":
    # Small, deterministic config.
    B = 2
    num_features = 32
    in_nodes = 4
    out_nodes = 8

    key = jax.random.PRNGKey(0)
    kx, kw, kb = jax.random.split(key, 3)

    x = jax.random.normal(kx, (B, in_nodes * num_features), dtype=jnp.float32)

    # Deterministic param init mimicking Conv1d's kaiming-uniform fan-in bound.
    fan_in = num_features  # per-group input channels * kernel_size(=1)
    w_bound = math.sqrt(1.0 / fan_in) * math.sqrt(3.0)
    b_bound = 1.0 / math.sqrt(fan_in)
    weight = jax.random.uniform(
        kw, (in_nodes, out_nodes, num_features), minval=-w_bound, maxval=w_bound,
        dtype=jnp.float32)
    bias = jax.random.uniform(
        kb, (in_nodes, out_nodes), minval=-b_bound, maxval=b_bound,
        dtype=jnp.float32)

    # reshape=True path (init-time packing + forward).
    fwd = make_grouped_linear(
        weight, bias, in_nodes=in_nodes, num_features=num_features,
        out_nodes=out_nodes, reshape=True)
    out = jax.block_until_ready(fwd(x))
    ref = _reference(x, weight, bias, in_nodes=in_nodes,
                     num_features=num_features, out_nodes=out_nodes, reshape=True)
    assert out.shape == (B, out_nodes, in_nodes), out.shape
    assert jnp.allclose(out, ref, atol=1e-5, rtol=1e-5), "mismatch vs reference"

    # reshape=False path.
    fwd_flat = make_grouped_linear(
        weight, bias, in_nodes=in_nodes, num_features=num_features,
        out_nodes=out_nodes, reshape=False)
    out_flat = jax.block_until_ready(fwd_flat(x))
    ref_flat = _reference(x, weight, bias, in_nodes=in_nodes,
                          num_features=num_features, out_nodes=out_nodes,
                          reshape=False)
    assert out_flat.shape == (B, in_nodes * out_nodes)
    assert jnp.allclose(out_flat, ref_flat, atol=1e-5, rtol=1e-5)

    print("KERNEL_OK")
</pallas_src>

<mosaic_0001>
module attributes {stable_mosaic.version = 11 : i64} {
  func.func @_grouped_linear_kernel(%arg0: i32, %arg1: i32, %arg2: memref<2x128xf32, #tpu.memory_space<vmem>>, %arg3: memref<1x128x32xf32, #tpu.memory_space<vmem>>, %arg4: memref<1x1x32xf32, #tpu.memory_space<vmem>>, %arg5: memref<2x32xf32, #tpu.memory_space<vmem>>) attributes {dimension_semantics = [#tpu.dimension_semantics<parallel>, #tpu.dimension_semantics<parallel>], iteration_bounds = array<i64: 1, 1>, scalar_prefetch = 0 : i64, scratch_operands = 0 : i64, tpu.core_type = #tpu.core_type<tc>, window_params = [{transform_indices = @transform_0, window_bounds = array<i64: 2, 128>}, {transform_indices = @transform_1, window_bounds = array<i64: 1, 128, 32>}, {transform_indices = @transform_2, window_bounds = array<i64: 1, 1, 32>}, {transform_indices = @transform_3, window_bounds = array<i64: 2, 32>}]} {
    %c0 = arith.constant 0 : index
    %c0_0 = arith.constant 0 : index
    %0 = vector.load %arg2[%c0, %c0_0] : memref<2x128xf32, #tpu.memory_space<vmem>>, vector<2x128xf32>
    %c0_1 = arith.constant 0 : index
    %c0_2 = arith.constant 0 : index
    %c0_3 = arith.constant 0 : index
    %1 = vector.load %arg3[%c0_1, %c0_2, %c0_3] : memref<1x128x32xf32, #tpu.memory_space<vmem>>, vector<1x128x32xf32>
    %2 = vector.shape_cast %1 : vector<1x128x32xf32> to vector<128x32xf32>
    %cst = arith.constant dense<0.000000e+00> : vector<2x32xf32>
    %3 = tpu.matmul %0, %2, %cst {dimension_numbers = #tpu.dot_dimension_numbers<[1], [0], [0], [1], [0, 0, 1, 1], [], []>} : vector<2x128xf32>, vector<128x32xf32>, vector<2x32xf32> -> vector<2x32xf32>
    %c0_4 = arith.constant 0 : index
    %c0_5 = arith.constant 0 : index
    %c0_6 = arith.constant 0 : index
    %4 = vector.load %arg4[%c0_4, %c0_5, %c0_6] : memref<1x1x32xf32, #tpu.memory_space<vmem>>, vector<1x1x32xf32>
    %5 = vector.shape_cast %4 : vector<1x1x32xf32> to vector<1x32xf32>
    %6 = vector.broadcast %5 : vector<1x32xf32> to vector<2x32xf32>
    %7 = arith.addf %3, %6 : vector<2x32xf32>
    %c0_7 = arith.constant 0 : index
    %c0_8 = arith.constant 0 : index
    %8 = vector.load %arg5[%c0_7, %c0_8] : memref<2x32xf32, #tpu.memory_space<vmem>>, vector<2x32xf32>
    tpu.vector_store %arg5[%c0_7, %c0_8], %7 {strides = array<i32>} : memref<2x32xf32, #tpu.memory_space<vmem>>, vector<2x32xf32>,
    return
  }
  func.func @transform_0(%arg0: i32, %arg1: i32) -> (i32, i32) {
    %c0_i32 = arith.constant 0 : i32
    return %arg1, %arg0 : i32, i32
  }
  func.func @transform_1(%arg0: i32, %arg1: i32) -> (i32, i32, i32) {
    %c0_i32 = arith.constant 0 : i32
    %c0_i32_0 = arith.constant 0 : i32
    %c0_i32_1 = arith.constant 0 : i32
    return %arg0, %c0_i32, %c0_i32_0 : i32, i32, i32
  }
  func.func @transform_2(%arg0: i32, %arg1: i32) -> (i32, i32, i32) {
    %c0_i32 = arith.constant 0 : i32
    %c0_i32_0 = arith.constant 0 : i32
    %c0_i32_1 = arith.constant 0 : i32
    return %arg0, %c0_i32, %c0_i32_0 : i32, i32, i32
  }
  func.func @transform_3(%arg0: i32, %arg1: i32) -> (i32, i32) {
    %c0_i32 = arith.constant 0 : i32
    return %arg1, %arg0 : i32, i32
  }
}

</mosaic_0001>

<bundles_post_ra>
// kernel: tpu_custom_call.1
= control target key start
LH: loop header
LB: loop body
LE: loop exit
PB: predicated region body
PF: predicated region fallthrough
CT: control target
= control target key end

     0   :  { %s180_s0 = inlined_call_operand.vmem [shape: f32[2,128], index: 0, kind: input, shape index: {}]   ;;  %s181_s1 = inlined_call_operand.vmem [shape: f32[1,128,32], index: 1, kind: input, shape index: {}]   ;;  %s182_s2 = inlined_call_operand.vmem [shape: f32[1,1,32], index: 2, kind: input, shape index: {}]   ;;  %s183_s3 = inlined_call_operand.hbm [shape: f32[2,32], index: 3, kind: output, shape index: {}]  }
   0x1   :  { %v31_v0 = vld [vmem:[%s181_s1 + $0x78] sm:$0xff]  ;;  %v30_v1 = vld [vmem:[%s181_s1 + $0x70] sm:$0xff]  ;;  %v29_v2 = vld [vmem:[%s181_s1 + $0x68] sm:$0xff] }
   0x2   :  { %36 = vmatpush.msra.mxu0 %v31_v0  ;;  %v28_v3 = vld [vmem:[%s181_s1 + $0x60] sm:$0xff]  ;;  %v27_v4 = vld [vmem:[%s181_s1 + $0x58] sm:$0xff] }
   0x4   :  { %37 = vmatpush.msra.mxu0 %v30_v1 }
   0x6   :  { %38 = vmatpush.msra.mxu0 %v29_v2 }
   0x7   :  { %8 = vsyncpa [#allocation3], 0  ;;  %v26_v5 = vld [vmem:[%s181_s1 + $0x50] sm:$0xff]  ;;  %v25_v6 = vld [vmem:[%s181_s1 + $0x48] sm:$0xff]  ;;  %s102_s21 = smov [#allocation2]   ;;  %s65_s25 = sshll.u32 %s183_s3, 4  ;;  %s66_s25 = int_to_ptr.hbm [resolvable:$true] %s65_s25 }
   0x8   :  { %39 = vmatpush.msra.mxu0 %v28_v3  ;;  %v24_v7 = vld [vmem:[%s181_s1 + $0x40] sm:$0xff]  ;;  %v23_v8 = vld [vmem:[%s181_s1 + $0x38] sm:$0xff]  ;;  %v22_v9 = vld [vmem:[%s181_s1 + $0x30] sm:$0xff]  ;;  %s63_s22 = sshll.u32 %s102_s21, 4  ;;  %vm56_vm0 = vcmask 254976   ;;  %s64_s22 = int_to_ptr.vmem [resolvable:$true] %s63_s22 }
   0x9   :  { %v21_v10 = vld [vmem:[%s181_s1 + $0x28] sm:$0xff]  ;;  %v20_v11 = vld [vmem:[%s181_s1 + $0x20] sm:$0xff]  ;;  %v19_v12 = vld [vmem:[%s181_s1 + $0x18] sm:$0xff] }
   0xa   :  { %40 = vmatpush.msra.mxu0 %v27_v4  ;;  %v18_v13 = vld [vmem:[%s181_s1 + $0x10] sm:$0xff]  ;;  %v17_v14 = vld [vmem:[%s181_s1 + $0x8] sm:$0xff]  ;;  %v16_v15 = vld [vmem:[%s181_s1] sm:$0xff] }
   0xb   :  { %v15_v16 = vld [vmem:[%s180_s0] sm:$0x3] }
   0xc   :  { %41 = vmatpush.msra.mxu0 %v26_v5  ;;  %v75_v17 = vld [vmem:[%s182_s2] ss:$0 sm:$0xff] }
   0xe   :  { %42 = vmatpush.msra.mxu0 %v25_v6 }
  0x10   :  { %43 = vmatpush.msra.mxu0 %v24_v7 }
  0x12   :  { %44 = vmatpush.msra.mxu0 %v23_v8 }
  0x14   :  { %45 = vmatpush.msra.mxu0 %v22_v9 }
  0x16   :  { %46 = vmatpush.msra.mxu0 %v21_v10 }
  0x18   :  { %47 = vmatpush.msra.mxu0 %v20_v11 }
  0x1a   :  { %48 = vmatpush.msra.mxu0 %v19_v12 }
  0x1c   :  { %49 = vmatpush.msra.mxu0 %v18_v13 }
  0x1e   :  { %50 = vmatpush.msra.mxu0 %v17_v14 }
  0x20   :  { %51 = vmatpush.msra.mxu0 %v16_v15 }
  0x21   :  { %52 = vmatmul.f32.vlgmr.msra.gmra.mxu0 %v15_v16 }
  0x9e   :  { %v53_v18 = vpop.f32.mrf.mxu0 }
  0x9f   :  { %v54_v19 = vadd.f32 %v75_v17, %v53_v18 }
  0xa1   :  { %57 = vst.msk [vmem:[#allocation2] sm:$0x3] %vm56_vm0, %v54_v19 }
  0xa2   :  { %68 = dma.vmem_to_hbm [thread:$0]  %s64_s22, 32, %s66_s25, [#allocation3]  }
  0xa3   :  { %100 = dma.done.wait [#allocation3], 32  }
  0xa4   :  { %101 = vsyncadd [#allocation3], 4294967264 }
  0xa5   :  { %73 = vsyncpa [#allocation3], 1 }

</bundles_post_ra>
